<compile_context>
chip_gen: v6e
topology: v6e:2x2x1
jax: 0.10.0
libtpu: 0.0.40
codegen_flags: <defaults>
</compile_context>

<pallas_src>
import jax
import jax.numpy as jnp
from jax.experimental import pallas as pl
from jax.experimental.pallas import tpu as pltpu

EPS = 1e-5                      # PyTorch BatchNorm1d default eps
INPUT_SIZE = 10
HIDDEN_SIZES = [16, 8, 4]
N_LAYERS = len(HIDDEN_SIZES) + 1


def _cdiv(a, b):
    return (a + b - 1) // b


def _round_up(a, b):
    return _cdiv(a, b) * b


# ---------------------------------------------------------------------------
# Kernel: whole (BN-folded, batch-packed) MLP forward for one tile of packed
# rows, entirely in VMEM.  Weights are block-diagonal kron(I_P, W_layer).
# ---------------------------------------------------------------------------
def mlp_kernel(x_ref, w1_ref, w2_ref, w3_ref, w4_ref,
               b1_ref, b2_ref, b3_ref, b4_ref, o_ref):
    cdt = w1_ref.dtype                         # MXU input dtype (bf16 or f32)

    h = x_ref[...]                             # (tr, P*10)
    z = jnp.dot(h, w1_ref[...], preferred_element_type=jnp.float32) + b1_ref[...]
    h = jnp.maximum(z, 0.0).astype(cdt)        # (tr, P*16)

    z = jnp.dot(h, w2_ref[...], preferred_element_type=jnp.float32) + b2_ref[...]
    h = jnp.maximum(z, 0.0).astype(cdt)        # (tr, P*8)

    z = jnp.dot(h, w3_ref[...], preferred_element_type=jnp.float32) + b3_ref[...]
    h = jnp.maximum(z, 0.0).astype(cdt)        # (tr, P*4)

    z = jnp.dot(h, w4_ref[...], preferred_element_type=jnp.float32) + b4_ref[...]
    o_ref[...] = jax.nn.sigmoid(z)             # (tr, P) f32, lane-dense-ish store


# ---------------------------------------------------------------------------
# Host-side parameter handling.
# ---------------------------------------------------------------------------
def init_params(key, input_size=INPUT_SIZE, hidden_sizes=HIDDEN_SIZES):
    """Deterministic parameter init mimicking PyTorch defaults (unfused)."""
    params = []
    prev = input_size
    for h in hidden_sizes:
        key, kw, kb, kg, kbe, km, kv = jax.random.split(key, 7)
        bound = 1.0 / jnp.sqrt(prev)
        w = jax.random.uniform(kw, (prev, h), jnp.float32, -bound, bound)
        b = jax.random.uniform(kb, (1, h), jnp.float32, -bound, bound)
        gamma = jax.random.uniform(kg, (1, h), jnp.float32, 0.5, 1.5)
        beta = 0.1 * jax.random.normal(kbe, (1, h), jnp.float32)
        rmean = 0.1 * jax.random.normal(km, (1, h), jnp.float32)
        rvar = jax.random.uniform(kv, (1, h), jnp.float32, 0.5, 1.5)
        params.extend([w, b, gamma, beta, rmean, rvar])
        prev = h
    key, kw, kb = jax.random.split(key, 3)
    bound = 1.0 / jnp.sqrt(prev)
    params.append(jax.random.uniform(kw, (prev, 1), jnp.float32, -bound, bound))
    params.append(jax.random.uniform(kb, (1, 1), jnp.float32, -bound, bound))
    return params


def fold_params(params):
    """Fold BatchNorm (eval mode) into the preceding Linear. Returns per-layer
    (in,out) weights and (1,out) biases, f32."""
    ws, bs = [], []
    idx = 0
    for _ in HIDDEN_SIZES:
        w, b, g, be, m, v = params[idx:idx + 6]
        idx += 6
        scale = g / jnp.sqrt(v + EPS)          # (1, H)
        ws.append(w * scale)                   # scale each output column
        bs.append((b - m) * scale + be)        # folded bias
    w_out, b_out = params[idx:idx + 2]
    ws.append(w_out)
    bs.append(b_out)
    return ws, bs


def pack_params(ws, bs, pack, compute_dtype):
    """Block-diagonal pack: W_packed = kron(I_P, W), bias tiled P times."""
    eye = jnp.eye(pack, dtype=jnp.float32)
    wps = [jnp.kron(eye, w).astype(compute_dtype) for w in ws]     # (P*in, P*out)
    bps = [jnp.tile(b, (1, pack)).astype(jnp.float32) for b in bs] # (1, P*out)
    return wps, bps


# ---------------------------------------------------------------------------
# Wrapper: grid over packed batch rows, weight/bias slabs replicated (constant
# index map -> loaded once, VMEM-resident across grid steps).
# ---------------------------------------------------------------------------
def improved_model_forward(x, params, *, pack=16, max_tile_rows=2048,
                           compute_dtype=jnp.bfloat16):
    B, F = x.shape
    assert F == INPUT_SIZE

    ws, bs = fold_params(params)
    wps, bps = pack_params(ws, bs, pack, compute_dtype)

    # Pad B only up to a multiple of the pack factor (<= pack-1 rows).
    Bp = _round_up(B, pack)
    if Bp != B:
        x = jnp.pad(x, ((0, Bp - B), (0, 0)))   # tail rows discarded by [:B] below
    rows = Bp // pack
    xp = x.astype(compute_dtype).reshape(rows, pack * F)   # free row-major reshape

    # Tile selection: as big as possible (amortize ~0.35us/step) but keep the
    # grid length >= 2 so v7x's 2 TensorCores both get work.  Tile-level
    # raggedness (rows % tr != 0) is handled by Pallas partial blocks.
    if rows <= 8:
        tr = rows                               # single full block (tiny batch)
    else:
        tr = min(max_tile_rows, max(8, _round_up(_cdiv(rows, 2), 8)))
    grid = _cdiv(rows, tr)

    layer_dims = [w.shape for w in wps]
    cost = pl.CostEstimate(
        flops=int(rows * sum(2 * kin * kout for kin, kout in layer_dims)),
        transcendentals=int(rows * pack),
        bytes_accessed=int(xp.size * xp.dtype.itemsize + rows * pack * 4
                           + sum(w.size * w.dtype.itemsize for w in wps)
                           + sum(b.size * 4 for b in bps)),
    )

    in_specs = [pl.BlockSpec((tr, pack * F), lambda i: (i, 0))]
    in_specs += [pl.BlockSpec(w.shape, lambda i: (0, 0)) for w in wps]
    in_specs += [pl.BlockSpec(b.shape, lambda i: (0, 0)) for b in bps]

    out = pl.pallas_call(
        mlp_kernel,
        out_shape=jax.ShapeDtypeStruct((rows, pack), jnp.float32),
        grid=(grid,),
        in_specs=in_specs,
        out_specs=pl.BlockSpec((tr, pack), lambda i: (i, 0)),
        compiler_params=pltpu.CompilerParams(
            dimension_semantics=("parallel",)),
        cost_estimate=cost,
    )(xp, *wps, *bps)

    return out.reshape(Bp, 1)[:B]               # free reshape, drop pad rows


def reference_forward(x, params):
    """Pure-JAX reference on the UNFUSED params (validates BN folding + packing)."""
    h = x
    idx = 0
    for _ in HIDDEN_SIZES:
        w, b, g, be, m, v = params[idx:idx + 6]
        idx += 6
        z = h @ w + b
        z = (z - m) * (g / jnp.sqrt(v + EPS)) + be
        h = jnp.maximum(z, 0.0)
    w_out, b_out = params[idx:idx + 2]
    return jax.nn.sigmoid(h @ w_out + b_out)


# TODO(synk): training-mode Dropout / BatchNorm batch-statistics are not
# implemented (eval-mode forward only, matching module.eval()).

if __name__ == "__main__":
    key = jax.random.PRNGKey(0)
    key, kx, kp = jax.random.split(key, 3)
    params = init_params(kp)

    # 1) f32 compute path; B chosen so the grid has 2 blocks incl. a partial one.
    B = 640
    x = jax.random.normal(kx, (B, INPUT_SIZE), jnp.float32)
    ref = reference_forward(x, params)
    out = jax.block_until_ready(
        improved_model_forward(x, params, compute_dtype=jnp.float32))
    assert out.shape == (B, 1)
    assert jnp.allclose(out, ref, atol=1e-4, rtol=1e-3), "f32 mismatch vs reference"

    # 2) default bf16 compute path (f32 accumulation), loose tolerance.
    out_bf = jax.block_until_ready(improved_model_forward(x, params))
    assert out_bf.shape == (B, 1)
    assert jnp.allclose(out_bf, ref, atol=5e-2, rtol=5e-2), "bf16 mismatch vs reference"

    # 3) ragged batch (B not a multiple of the pack factor).
    B2 = 37
    x2 = jax.random.normal(jax.random.fold_in(kx, 1), (B2, INPUT_SIZE), jnp.float32)
    ref2 = reference_forward(x2, params)
    out2 = jax.block_until_ready(
        improved_model_forward(x2, params, compute_dtype=jnp.float32))
    assert out2.shape == (B2, 1)
    assert jnp.allclose(out2, ref2, atol=1e-4, rtol=1e-3), "ragged mismatch vs reference"

    # 4) v5e-style pack factor (8-row packing fits the 128-wide MXU exactly).
    out3 = jax.block_until_ready(
        improved_model_forward(x, params, pack=8, compute_dtype=jnp.float32))
    assert out3.shape == (B, 1)
    assert jnp.allclose(out3, ref, atol=1e-4, rtol=1e-3), "pack=8 mismatch vs reference"

    print("KERNEL_OK")
</pallas_src>

<mosaic_0001>
module attributes {stable_mosaic.version = 11 : i64} {
  func.func @mlp_kernel(%arg0: i32, %arg1: memref<24x160xf32, #tpu.memory_space<vmem>>, %arg2: memref<160x256xf32, #tpu.memory_space<vmem>>, %arg3: memref<256x128xf32, #tpu.memory_space<vmem>>, %arg4: memref<128x64xf32, #tpu.memory_space<vmem>>, %arg5: memref<64x16xf32, #tpu.memory_space<vmem>>, %arg6: memref<1x256xf32, #tpu.memory_space<vmem>>, %arg7: memref<1x128xf32, #tpu.memory_space<vmem>>, %arg8: memref<1x64xf32, #tpu.memory_space<vmem>>, %arg9: memref<1x16xf32, #tpu.memory_space<vmem>>, %arg10: memref<24x16xf32, #tpu.memory_space<vmem>>) attributes {dimension_semantics = [#tpu.dimension_semantics<parallel>], iteration_bounds = array<i64: 2>, scalar_prefetch = 0 : i64, scratch_operands = 0 : i64, tpu.core_type = #tpu.core_type<tc>, window_params = [{transform_indices = @transform_0, window_bounds = array<i64: 24, 160>}, {pipeline_mode = #tpu.pipeline_mode<synchronous>, transform_indices = @transform_1, window_bounds = array<i64: 160, 256>}, {pipeline_mode = #tpu.pipeline_mode<synchronous>, transform_indices = @transform_2, window_bounds = array<i64: 256, 128>}, {pipeline_mode = #tpu.pipeline_mode<synchronous>, transform_indices = @transform_3, window_bounds = array<i64: 128, 64>}, {pipeline_mode = #tpu.pipeline_mode<synchronous>, transform_indices = @transform_4, window_bounds = array<i64: 64, 16>}, {pipeline_mode = #tpu.pipeline_mode<synchronous>, transform_indices = @transform_5, window_bounds = array<i64: 1, 256>}, {pipeline_mode = #tpu.pipeline_mode<synchronous>, transform_indices = @transform_6, window_bounds = array<i64: 1, 128>}, {pipeline_mode = #tpu.pipeline_mode<synchronous>, transform_indices = @transform_7, window_bounds = array<i64: 1, 64>}, {pipeline_mode = #tpu.pipeline_mode<synchronous>, transform_indices = @transform_8, window_bounds = array<i64: 1, 16>}, {transform_indices = @transform_9, window_bounds = array<i64: 24, 16>}]} {
    %c0 = arith.constant 0 : index
    %c0_0 = arith.constant 0 : index
    %0 = vector.load %arg1[%c0, %c0_0] : memref<24x160xf32, #tpu.memory_space<vmem>>, vector<24x160xf32>
    %c0_1 = arith.constant 0 : index
    %c0_2 = arith.constant 0 : index
    %1 = vector.load %arg2[%c0_1, %c0_2] : memref<160x256xf32, #tpu.memory_space<vmem>>, vector<160x256xf32>
    %cst = arith.constant dense<0.000000e+00> : vector<24x256xf32>
    %2 = tpu.matmul %0, %1, %cst {dimension_numbers = #tpu.dot_dimension_numbers<[1], [0], [0], [1], [0, 0, 1, 1], [], []>} : vector<24x160xf32>, vector<160x256xf32>, vector<24x256xf32> -> vector<24x256xf32>
    %c0_3 = arith.constant 0 : index
    %c0_4 = arith.constant 0 : index
    %3 = vector.load %arg6[%c0_3, %c0_4] : memref<1x256xf32, #tpu.memory_space<vmem>>, vector<1x256xf32>
    %4 = vector.broadcast %3 : vector<1x256xf32> to vector<24x256xf32>
    %5 = arith.addf %2, %4 : vector<24x256xf32>
    %cst_5 = arith.constant 0.000000e+00 : f32
    %6 = vector.broadcast %cst_5 : f32 to vector<24x256xf32>
    %7 = arith.maximumf %5, %6 : vector<24x256xf32>
    %c0_6 = arith.constant 0 : index
    %c0_7 = arith.constant 0 : index
    %8 = vector.load %arg3[%c0_6, %c0_7] : memref<256x128xf32, #tpu.memory_space<vmem>>, vector<256x128xf32>
    %cst_8 = arith.constant dense<0.000000e+00> : vector<24x128xf32>
    %9 = tpu.matmul %7, %8, %cst_8 {dimension_numbers = #tpu.dot_dimension_numbers<[1], [0], [0], [1], [0, 0, 1, 1], [], []>} : vector<24x256xf32>, vector<256x128xf32>, vector<24x128xf32> -> vector<24x128xf32>
    %c0_9 = arith.constant 0 : index
    %c0_10 = arith.constant 0 : index
    %10 = vector.load %arg7[%c0_9, %c0_10] : memref<1x128xf32, #tpu.memory_space<vmem>>, vector<1x128xf32>
    %11 = vector.broadcast %10 : vector<1x128xf32> to vector<24x128xf32>
    %12 = arith.addf %9, %11 : vector<24x128xf32>
    %cst_11 = arith.constant 0.000000e+00 : f32
    %13 = vector.broadcast %cst_11 : f32 to vector<24x128xf32>
    %14 = arith.maximumf %12, %13 : vector<24x128xf32>
    %c0_12 = arith.constant 0 : index
    %c0_13 = arith.constant 0 : index
    %15 = vector.load %arg4[%c0_12, %c0_13] : memref<128x64xf32, #tpu.memory_space<vmem>>, vector<128x64xf32>
    %cst_14 = arith.constant dense<0.000000e+00> : vector<24x64xf32>
    %16 = tpu.matmul %14, %15, %cst_14 {dimension_numbers = #tpu.dot_dimension_numbers<[1], [0], [0], [1], [0, 0, 1, 1], [], []>} : vector<24x128xf32>, vector<128x64xf32>, vector<24x64xf32> -> vector<24x64xf32>
    %c0_15 = arith.constant 0 : index
    %c0_16 = arith.constant 0 : index
    %17 = vector.load %arg8[%c0_15, %c0_16] : memref<1x64xf32, #tpu.memory_space<vmem>>, vector<1x64xf32>
    %18 = vector.broadcast %17 : vector<1x64xf32> to vector<24x64xf32>
    %19 = arith.addf %16, %18 : vector<24x64xf32>
    %cst_17 = arith.constant 0.000000e+00 : f32
    %20 = vector.broadcast %cst_17 : f32 to vector<24x64xf32>
    %21 = arith.maximumf %19, %20 : vector<24x64xf32>
    %c0_18 = arith.constant 0 : index
    %c0_19 = arith.constant 0 : index
    %22 = vector.load %arg5[%c0_18, %c0_19] : memref<64x16xf32, #tpu.memory_space<vmem>>, vector<64x16xf32>
    %cst_20 = arith.constant dense<0.000000e+00> : vector<24x16xf32>
    %23 = tpu.matmul %21, %22, %cst_20 {dimension_numbers = #tpu.dot_dimension_numbers<[1], [0], [0], [1], [0, 0, 1, 1], [], []>} : vector<24x64xf32>, vector<64x16xf32>, vector<24x16xf32> -> vector<24x16xf32>
    %c0_21 = arith.constant 0 : index
    %c0_22 = arith.constant 0 : index
    %24 = vector.load %arg9[%c0_21, %c0_22] : memref<1x16xf32, #tpu.memory_space<vmem>>, vector<1x16xf32>
    %25 = vector.broadcast %24 : vector<1x16xf32> to vector<24x16xf32>
    %26 = arith.addf %23, %25 : vector<24x16xf32>
    %27 = arith.negf %26 : vector<24x16xf32>
    %28 = math.exp %27 : vector<24x16xf32>
    %cst_23 = arith.constant 1.000000e+00 : f32
    %29 = vector.broadcast %cst_23 : f32 to vector<24x16xf32>
    %30 = arith.addf %29, %28 : vector<24x16xf32>
    %31 = arith.divf %29, %30 : vector<24x16xf32>
    %c0_24 = arith.constant 0 : index
    %c0_25 = arith.constant 0 : index
    %32 = vector.load %arg10[%c0_24, %c0_25] : memref<24x16xf32, #tpu.memory_space<vmem>>, vector<24x16xf32>
    tpu.vector_store %arg10[%c0_24, %c0_25], %31 {strides = array<i32>} : memref<24x16xf32, #tpu.memory_space<vmem>>, vector<24x16xf32>,
    return
  }
  func.func @transform_0(%arg0: i32) -> (i32, i32) {
    %c0_i32 = arith.constant 0 : i32
    %c0_i32_0 = arith.constant 0 : i32
    return %arg0, %c0_i32 : i32, i32
  }
  func.func @transform_1(%arg0: i32) -> (i32, i32) {
    %c0_i32 = arith.constant 0 : i32
    %c0_i32_0 = arith.constant 0 : i32
    %c0_i32_1 = arith.constant 0 : i32
    return %c0_i32, %c0_i32_0 : i32, i32
  }
  func.func @transform_2(%arg0: i32) -> (i32, i32) {
    %c0_i32 = arith.constant 0 : i32
    %c0_i32_0 = arith.constant 0 : i32
    %c0_i32_1 = arith.constant 0 : i32
    return %c0_i32, %c0_i32_0 : i32, i32
  }
  func.func @transform_3(%arg0: i32) -> (i32, i32) {
    %c0_i32 = arith.constant 0 : i32
    %c0_i32_0 = arith.constant 0 : i32
    %c0_i32_1 = arith.constant 0 : i32
    return %c0_i32, %c0_i32_0 : i32, i32
  }
  func.func @transform_4(%arg0: i32) -> (i32, i32) {
    %c0_i32 = arith.constant 0 : i32
    %c0_i32_0 = arith.constant 0 : i32
    %c0_i32_1 = arith.constant 0 : i32
    return %c0_i32, %c0_i32_0 : i32, i32
  }
  func.func @transform_5(%arg0: i32) -> (i32, i32) {
    %c0_i32 = arith.constant 0 : i32
    %c0_i32_0 = arith.constant 0 : i32
    %c0_i32_1 = arith.constant 0 : i32
    return %c0_i32, %c0_i32_0 : i32, i32
  }
  func.func @transform_6(%arg0: i32) -> (i32, i32) {
    %c0_i32 = arith.constant 0 : i32
    %c0_i32_0 = arith.constant 0 : i32
    %c0_i32_1 = arith.constant 0 : i32
    return %c0_i32, %c0_i32_0 : i32, i32
  }
  func.func @transform_7(%arg0: i32) -> (i32, i32) {
    %c0_i32 = arith.constant 0 : i32
    %c0_i32_0 = arith.constant 0 : i32
    %c0_i32_1 = arith.constant 0 : i32
    return %c0_i32, %c0_i32_0 : i32, i32
  }
  func.func @transform_8(%arg0: i32) -> (i32, i32) {
    %c0_i32 = arith.constant 0 : i32
    %c0_i32_0 = arith.constant 0 : i32
    %c0_i32_1 = arith.constant 0 : i32
    return %c0_i32, %c0_i32_0 : i32, i32
  }
  func.func @transform_9(%arg0: i32) -> (i32, i32) {
    %c0_i32 = arith.constant 0 : i32
    %c0_i32_0 = arith.constant 0 : i32
    return %arg0, %c0_i32 : i32, i32
  }
}

</mosaic_0001>

<bundles_post_ra>
// kernel: tpu_custom_call.1
= control target key start
LH: loop header
LB: loop body
LE: loop exit
PB: predicated region body
PF: predicated region fallthrough
CT: control target
= control target key end

     0   :  { %14 = vsyncpa [#allocation3], 0  ;;  %s2061_s0 = inlined_call_operand.hbm [shape: f32[40,160], index: 0, kind: input, shape index: {}]   ;;  %s2062_s1 = inlined_call_operand.hbm [shape: f32[160,256], index: 1, kind: input, shape index: {}]   ;;  %s2063_s2 = inlined_call_operand.vmem [shape: f32[256,128], index: 2, kind: input, shape index: {}]   ;;  %s2064_s3 = inlined_call_operand.vmem [shape: f32[128,64], index: 3, kind: input, shape index: {}]   ;;  %s2065_s4 = inlined_call_operand.vmem [shape: f32[64,16], index: 4, kind: input, shape index: {}]   ;;  %s2066_s5 = inlined_call_operand.vmem [shape: f32[1,256], index: 5, kind: input, shape index: {}]   ;;  %s2067_s6 = inlined_call_operand.vmem [shape: f32[1,128], index: 6, kind: input, shape index: {}]   ;;  %s2068_s7 = inlined_call_operand.vmem [shape: f32[1,64], index: 7, kind: input, shape index: {}]   ;;  %s2069_s8 = inlined_call_operand.vmem [shape: f32[1,16], index: 8, kind: input, shape index: {}]   ;;  %s2070_s9 = inlined_call_operand.vmem [shape: f32[40,16], index: 9, kind: output, shape index: {}]  }
   0x1   :  { %16 = vsyncpa [#allocation3 + $0x1], 0 }
   0x2   :  { %17 = vsyncpa [#allocation5], 0  ;;  %s1667_s30 = smov 0   ;;  %s1669_s10 = smov 0  }
   0x3   :  { %s1671_s11 = smov 0   ;;  %s1673_s12 = smov 0  }
   0x4 LB: > { %s1686_s13 = sadd.s32 4294967295, %s1575_s12   ;;  %s1689_s14 = sadd.s32 1, %s1575_s12   ;;  %s1575_s12 = sphi %s1673_s12, %s2081_s12   ;;  %s1571_s11 = sphi %s1671_s11, %s2080_s11   ;;  %s1567_s10 = sphi %s1669_s10, %s2079_s10   ;;  %s1563_s30 = sphi %s1667_s30, %s2078_s30  }
   0x5   : > { %s27_s15 = ssub.s32 %s1575_s12, %s1689_s14  ;;  %s30_s16 = sadd.s32 1, %s1571_s11 }
   0x6   : > { %p28_p0 = scmp.eq.s32.totalorder %s27_s15, 0  ;;  %p37_p1 = scmp.ne.s32.totalorder %s1571_s11, %s1567_s10 }
   0x7   : > { %p38_p2 = scmp.eq.s32.totalorder %s1575_s12, 0  ;;  %p43_p3 = scmp.ne.s32.totalorder %s1567_s10, %s1563_s30 }
   0x8   : > { %s1699_s17 = scalar_select %p28_p0, %s1571_s11, %s30_s16  }
   0x9   : > { %p1701_p4 = por %p38_p2, %p37_p1  ;;  %p44_p5 = scmp.eq.s32.totalorder %s1686_s13, 0 }
   0xa   : > { %p235_p6 = scmp.eq.s32.totalorder %s1686_s13, 1  ;;  %p1141_p7 = scmp.ge.s32.totalorder %s1575_s12, 1 }
   0xb   : > { %p1710_p8 = por %p44_p5, %p43_p3  ;;  %p248_p9 = scmp.lt.s32.totalorder %s1575_s12, 3 }
   0xc   : > { %p1715_p10 = por %p235_p6, %p37_p1  ;;  %s1609_s22 = smov [#allocation4]  }
   0xd   : > { %s2073_s19 = scalar_select %p1710_p8, 1, 0 }
   0xe   : > { %s2074_s20 = scalar_select %p1715_p10, 1, 0 }
   0xf   : > { %p1719_p11 = pnand %p1141_p7, %p248_p9  ;;  %s260_s23 = sshll.u32 %s1609_s22, 4  ;;  %s261_s23 = int_to_ptr.vmem [resolvable:$true] %s260_s23 }
  0x10   : > { %s1464_s24 = scalar_lea.vmem %s261_s23, 5120  ;;  %p1472_p6 = scmp.lt.s32.totalorder %s261_s23, %s261_s23 }
  0x11   : > { %p1327_p12 = pneg %p1719_p11  ;;  %p1465_p2 = scmp.ne.s32.totalorder %s261_s23, %s1464_s24 }
  0x12   : > { %p1473_p8 = scmp.lt.s32.totalorder %s1464_s24, %s1464_s24 }
  0x13   : > { %p1328_p13 = pnand %p1327_p12, %p44_p5 }
  0x14   : > { %p1474_p10 = por %p1473_p8, %p1472_p6 }
  0x15   : > { %p1455_p0 = pneg %p1328_p13 }
  0x17   : > { %p1467_p3 = pnand %p1465_p2, %p1455_p0 }
  0x19   : > { %p1468_p1 = pneg %p1467_p3 }
  0x1b   : > { %p1475_p7 = pnand %p1474_p10, %p1468_p1 }
  0x1d   : > { %1478 = shalt.err (!%p1475_p7)
}
  0x1e   : > { %s1610_s25 = smov 256   ;;  %s1611_s26 = smov 16  }
  0x1f   : > { %1330 = dma.hbm_to_vmem [thread:$0]  (!%p1328_p13), %s2062_s1, 5120, %s261_s23, [#allocation5], %s1610_s25, %s1610_s25, %s1611_s26  }
  0x20   : > { %p1143_p9 = scmp.ge.s32.totalorder %s1575_s12, 2 }
  0x22   : > { %291 = sbr.rel (%p1143_p9) target bundleno = 73 (0x49), region = 48 }
  0x27   : > { %294 = sbr.rel (!%p1701_p4) target bundleno = 73 (0x49), region = 52  ;;  %s295_s29 = sand.u32 (%p1701_p4), 1, %s1571_s11  }
  0x28   : > { %s300_s30 = smul.u32 (%p1701_p4), 3, %s1575_s12  ;;  %s1738_s27 = scalar_lea.sflag (%p1701_p4), [#allocation3], %s295_s29 }
  0x29   : > { %s1319_s15 = smul.u32 (%p1701_p4), 48, %s295_s29 }
  0x2a   : > { %s301_s16 = ssub.s32 (%p1701_p4), 5, %s300_s30 }
  0x2b   : > { %p302_p8 = scmp.lt.s32.totalorder (%p1701_p4), %s301_s16, 3  ;;  %s299_s23 = scalar_lea.vmem (%p1701_p4), [#allocation2], %s1319_s15 }
  0x2d   : > { %s2083_s16 = smov (!%p302_p8, %s301_s16), 3 }
  0x2e   : > { %s1735_s22 = sshll.u32 %s2083_s16, 8 }
  0x2f   : > { %s307_s24 = ssub.s32 768, %s1735_s22 }
  0x30   : > { %308 = vsyncadd %s1738_s27, %s307_s24  ;;  %p1146_p4 = scmp.ne.s32.totalorder %s1735_s22, 0  ;;  %s1181_s18 = smul.u32 768, %s1575_s12 }
  0x31   : > { %s314_s25 = sshll.u32 %s299_s23, 4  ;;  %s1483_s12 = scalar_lea.hbm %s2061_s0, 1280  ;;  %s1748_s25 = int_to_ptr.vmem [resolvable:$true] %s314_s25 }
  0x32   : > { %s1746_s30 = scalar_lea.hbm %s2061_s0, %s1181_s18 }
  0x33   : > { %s1479_s29 = scalar_lea.hbm %s1746_s30, %s1735_s22  ;;  %p1484_p0 = scmp.lt.s32.totalorder %s1746_s30, %s2061_s0 }
  0x34   : > { %p1480_p10 = scmp.ne.s32.totalorder %s1746_s30, %s1479_s29  ;;  %p1485_p2 = scmp.lt.s32.totalorder %s1483_s12, %s1479_s29 }
  0x36   : > { %p1481_p12 = pnand %p1480_p10, %p1146_p4  ;;  %p1486_p3 = por %p1485_p2, %p1484_p0 }
  0x38   : > { %p1482_p13 = pneg %p1481_p12 }
  0x3a   : > { %p1487_p1 = pnand %p1486_p3, %p1482_p13 }
  0x3c   : > { %1490 = shalt.err (!%p1487_p1)
}
  0x3d   : > { %s1491_s18 = scalar_lea.vmem %s1748_s25, %s1735_s22  ;;  %s1612_s26 = smov [#allocation2]  }
  0x3e   : > { %p1492_p6 = scmp.ne.s32.totalorder %s1748_s25, %s1491_s18  ;;  %s1495_s28 = sshll.u32 %s1612_s26, 4  ;;  %s1496_s28 = int_to_ptr.vmem [resolvable:$false] %s1495_s28 }
  0x3f   : > { %s1497_s15 = scalar_lea.vmem %s1496_s28, 1536  ;;  %p1498_p8 = scmp.lt.s32.totalorder %s1748_s25, %s1496_s28 }
  0x40   : > { %p1493_p7 = pnand %p1492_p6, %p1146_p4  ;;  %p1499_p10 = scmp.lt.s32.totalorder %s1497_s15, %s1491_s18 }
  0x42   : > { %p1494_p9 = pneg %p1493_p7  ;;  %p1500_p12 = por %p1499_p10, %p1498_p8 }
  0x44   : > { %p1501_p0 = pnand %p1500_p12, %p1494_p9 }
  0x46   : > { %1504 = shalt.err (!%p1501_p0)
}
  0x47   : > { %s1613_s29 = smov 256   ;;  %s1614_s16 = smov 16  }
  0x48   : > { %320 = dma.hbm_to_vmem [thread:$0]  (%p1146_p4), %s1746_s30, %s1735_s22, %s1748_s25, %s1738_s27, %s1613_s29, %s1613_s29, %s1614_s16  }
  0x49 PF: > { %326 = sbr.rel (%p1719_p11) target bundleno = 1009 (0x3f1), region = 56  ;;  %s1777_s12 = sand.u32 (!%p1719_p11), 1, %s1567_s10  }
  0x4a   : > { %s1320_s24 = smul.u32 (!%p1719_p11), 48, %s1777_s12  ;;  %s329_s23 = scalar_lea.sflag (!%p1719_p11), [#allocation3], %s1777_s12 }
  0x4b   : > { %p2076_p13 = scmp.ne.s32.totalorder (!%p1719_p11), %s2073_s19, 0 }
  0x4c   : > { %s1781_s18 = scalar_lea.vmem (!%p1719_p11), [#allocation2], %s1320_s24 }
  0x4e   : > { %1554 = dma.done.wait (%p2076_p13), %s329_s23, 768  }
  0x4f   : > { %1556 = vsyncadd (%p2076_p13), %s329_s23, 4294966528 }
  0x50   : > { %1558 = dma.done.wait (%p44_p5), [#allocation5], 5120  }
  0x51   : > { %1560 = vsyncadd (%p44_p5), [#allocation5], 4294962176  ;;  %v418_v0 = vld [vmem:[#allocation4 + $0xf8] sm:$0xff]  ;;  %v417_v1 = vld [vmem:[#allocation4 + $0xf0] sm:$0xff]  ;;  %vm439_vm0 = vcmask 261120   ;;  %vm1616_vm1 = vmmov 0  }
  0x52   : > { %v416_v2 = vld [vmem:[#allocation4 + $0xe8] sm:$0xff]  ;;  %449 = vmatprep.subr.mxu0 %v418_v0  ;;  %v415_v3 = vld [vmem:[#allocation4 + $0xe0] sm:$0xff]  ;;  %v414_v4 = vld [vmem:[#allocation4 + $0xd8] sm:$0xff]  ;;  %vm781_vm2 = vcmask 523264   ;;  %s1321_s24 = smul.u32 24, %s1777_s12  ;;  %vm889_vm3 = vcmask 130048  }
  0x53   : > { %450 = vmatpush1.msra.mxu0 %v417_v1  ;;  %v413_v5 = vld [vmem:[#allocation4 + $0xd0] sm:$0xff]  ;;  %v412_v6 = vld [vmem:[#allocation4 + $0xc8] sm:$0xff]  ;;  %v411_v7 = vld [vmem:[#allocation4 + $0xc0] sm:$0xff]  ;;  %p2077_p5 = scmp.ne.s32.totalorder %s2074_s20, 0 }
  0x54   : > { %451 = vmatprep.subr.mxu0 %v416_v2  ;;  %v410_v8 = vld [vmem:[#allocation4 + $0xb8] sm:$0xff]  ;;  %v409_v9 = vld [vmem:[#allocation4 + $0xb0] sm:$0xff]  ;;  %v408_v10 = vld [vmem:[#allocation4 + $0xa8] sm:$0xff]  ;;  %s2017_s23 = scalar_lea.vmem [#allocation6], %s1321_s24   ;;  %s900_s19 = smul.u32 (%p2077_p5), 3, %s1686_s13 }
  0x55   : > { %452 = vmatpush1.msra.mxu0 %v415_v3  ;;  %v407_v11 = vld [vmem:[#allocation4 + $0xa0] sm:$0xff]  ;;  %v406_v12 = vld [vmem:[#allocation4 + $0x98] sm:$0xff]  ;;  %v405_v13 = vld [vmem:[#allocation4 + $0x90] sm:$0xff]  ;;  %s1180_s12 = smul.u32 (%p2077_p5), 24, %s1686_s13 }
  0x56   : > { %453 = vmatprep.subr.mxu0 %v414_v4  ;;  %v404_v14 = vld [vmem:[#allocation4 + $0x88] sm:$0xff]  ;;  %v403_v15 = vld [vmem:[#allocation4 + $0x80] sm:$0xff]  ;;  %v402_v17 = vld [vmem:[#allocation4 + $0x78] sm:$0xff]  ;;  %s901_s21 = ssub.s32 (%p2077_p5), 5, %s900_s19 }
  0x57   : > { %454 = vmatpush1.msra.mxu0 %v413_v5  ;;  %v382_v16 = vld [vmem:[%s1781_s18 + $0x8] sm:$0xff]  ;;  %v401_v18 = vld [vmem:[#allocation4 + $0x70] sm:$0xff]  ;;  %v399_v24 = vld [vmem:[#allocation4 + $0x60] sm:$0xff]  ;;  %p902_p11 = scmp.lt.s32.totalorder (%p2077_p5), %s901_s21, 3 }
  0x58   : > { %455 = vmatprep.subr.mxu0 %v412_v6  ;;  %1153 = vmatprep.mubr.msk.f32.mxu0 %vm439_vm0, %v382_v16  ;;  %v569_v19 = vld [vmem:[%s2063_s2 + $0xf8] sm:$0xff]  ;;  %v400_v21 = vld [vmem:[#allocation4 + $0x68] sm:$0xff]  ;;  %v568_v22 = vld [vmem:[%s2063_s2 + $0xf0] sm:$0xff] }
  0x59   : > { %456 = vmatpush1.msra.mxu0 %v411_v7  ;;  %v553_v20 = vld [vmem:[%s2063_s2 + $0x78] sm:$0xff]  ;;  %1182 = vmatprep.subr.mxu1 %v569_v19  ;;  %v552_v23 = vld [vmem:[%s2063_s2 + $0x70] sm:$0xff]  ;;  %v567_v25 = vld [vmem:[%s2063_s2 + $0xe8] sm:$0xff] }
  0x5a   : > { %457 = vmatprep.subr.mxu0 %v410_v8  ;;  %1183 = vmatpush3.msra.mxu1 %v553_v20  ;;  %v398_v26 = vld [vmem:[#allocation4 + $0x58] sm:$0xff]  ;;  %v551_v27 = vld [vmem:[%s2063_s2 + $0x68] sm:$0xff]  ;;  %v397_v28 = vld [vmem:[#allocation4 + $0x50] sm:$0xff] }
  0x5b   : > { %458 = vmatpush1.msra.mxu0 %v409_v9  ;;  %1184 = vmatprep.subr.mxu1 %v568_v22  ;;  %v566_v29 = vld [vmem:[%s2063_s2 + $0xe0] sm:$0xff]  ;;  %v396_v30 = vld [vmem:[#allocation4 + $0x48] sm:$0xff]  ;;  %v565_v33 = vld [vmem:[%s2063_s2 + $0xd8] sm:$0xff] }
  0x5c   : > { %459 = vmatprep.subr.mxu0 %v408_v10  ;;  %1185 = vmatpush3.msra.mxu1 %v552_v23  ;;  %v550_v31 = vld [vmem:[%s2063_s2 + $0x60] sm:$0xff]  ;;  %v394_v34 = vld [vmem:[#allocation4 + $0x38] sm:$0xff]  ;;  %v393_v36 = vld [vmem:[#allocation4 + $0x30] sm:$0xff] }
  0x5d   : > { %460 = vmatpush1.msra.mxu0 %v407_v11  ;;  %1186 = vmatprep.subr.mxu1 %v567_v25  ;;  %v395_v32 = vld [vmem:[#allocation4 + $0x40] sm:$0xff]  ;;  %v549_v35 = vld [vmem:[%s2063_s2 + $0x58] sm:$0xff]  ;;  %v564_v37 = vld [vmem:[%s2063_s2 + $0xd0] sm:$0xff] }
  0x5e   : > { %461 = vmatprep.subr.mxu0 %v406_v12  ;;  %1187 = vmatpush3.msra.mxu1 %v551_v27  ;;  %v392_v38 = vld [vmem:[#allocation4 + $0x28] sm:$0xff]  ;;  %v548_v39 = vld [vmem:[%s2063_s2 + $0x50] sm:$0xff]  ;;  %v391_v40 = vld [vmem:[#allocation4 + $0x20] sm:$0xff] }
  0x5f   : > { %462 = vmatpush1.msra.mxu0 %v405_v13  ;;  %1188 = vmatprep.subr.mxu1 %v566_v29  ;;  %v563_v41 = vld [vmem:[%s2063_s2 + $0xc8] sm:$0xff]  ;;  %v390_v42 = vld [vmem:[#allocation4 + $0x18] sm:$0xff]  ;;  %v389_v44 = vld [vmem:[#allocation4 + $0x10] sm:$0xff] }
  0x60   : > { %463 = vmatprep.subr.mxu0 %v404_v14  ;;  %1189 = vmatpush3.msra.mxu1 %v550_v31  ;;  %v547_v43 = vld [vmem:[%s2063_s2 + $0x48] sm:$0xff]  ;;  %v562_v45 = vld [vmem:[%s2063_s2 + $0xc0] sm:$0xff]  ;;  %v561_v49 = vld [vmem:[%s2063_s2 + $0xb8] sm:$0xff]  ;;  %v1615_v14 = vmov 0.0  }
  0x61   : > { %464 = vmatpush1.msra.mxu0 %v403_v15  ;;  %1190 = vmatprep.subr.mxu1 %v565_v33  ;;  %v388_v46 = vld [vmem:[#allocation4 + $0x8] sm:$0xff]  ;;  %v546_v47 = vld [vmem:[%s2063_s2 + $0x40] sm:$0xff]  ;;  %v426_v50 = vld [vmem:[#allocation4 + $0x138] sm:$0xff]  ;;  %v429_v15 = vlaneseq }
  0x62   : > { %465 = vmatprep.subr.mxu0 %v402_v17  ;;  %1191 = vmatpush3.msra.mxu1 %v549_v35  ;;  %v387_v48 = vld [vmem:[#allocation4] sm:$0xff]  ;;  %v545_v51 = vld [vmem:[%s2063_s2 + $0x38] sm:$0xff]  ;;  %v425_v52 = vld [vmem:[#allocation4 + $0x130] sm:$0xff] }
  0x63   : > { %466 = vmatpush1.msra.mxu0 %v401_v18  ;;  %1192 = vmatprep.subr.mxu1 %v564_v37  ;;  %v560_v53 = vld [vmem:[%s2063_s2 + $0xb0] sm:$0xff]  ;;  %v424_v54 = vld [vmem:[#allocation4 + $0x128] sm:$0xff]  ;;  %v423_v56 = vld [vmem:[#allocation4 + $0x120] sm:$0xff]  ;;  %v430_v16 = vshrl.u32 %v429_v15, 7 }
  0x64   : > { %467 = vmatprep.subr.mxu0 %v400_v21  ;;  %1193 = vmatpush3.msra.mxu1 %v548_v39  ;;  %v544_v55 = vld [vmem:[%s2063_s2 + $0x30] sm:$0xff]  ;;  %v559_v57 = vld [vmem:[%s2063_s2 + $0xa8] sm:$0xff]  ;;  %v422_v58 = vld [vmem:[#allocation4 + $0x118] sm:$0xff] }
  0x65   : > { %468 = vmatpush1.msra.mxu0 %v399_v24  ;;  %1194 = vmatprep.subr.mxu1 %v563_v41  ;;  %v543_v59 = vld [vmem:[%s2063_s2 + $0x28] sm:$0xff]  ;;  %v421_v60 = vld [vmem:[#allocation4 + $0x110] sm:$0xff]  ;;  %v558_v61 = vld [vmem:[%s2063_s2 + $0xa0] sm:$0xff]  ;;  %v431_v17 = vsub.s32 0, %v430_v16  ;;  %v435_v19 = vsub.s32 1, %v430_v16 }
  0x66   : > { %469 = vmatprep.subr.mxu0 %v398_v26  ;;  %1195 = vmatpush3.msra.mxu1 %v547_v43  ;;  %v420_v62 = vld [vmem:[#allocation4 + $0x108] sm:$0xff]  ;;  %v542_v63 = vld [vmem:[%s2063_s2 + $0x20] sm:$0xff]  ;;  %v557_v6 = vld [vmem:[%s2063_s2 + $0x98] sm:$0xff] }
  0x67   : > { %470 = vmatpush1.msra.mxu0 %v397_v28  ;;  %1196 = vmatprep.subr.mxu1 %v562_v45  ;;  %v419_v0 = vld [vmem:[#allocation4 + $0x100] sm:$0xff]  ;;  %v384_v2 = vld [vmem:[%s1781_s18 + $0x18] sm:$0xff]  ;;  %v386_v4 = vld [vmem:[%s1781_s18 + $0x28] sm:$0xff] }
  0x68   : > { %471 = vmatprep.subr.mxu0 %v396_v30  ;;  %1197 = vmatpush3.msra.mxu1 %v546_v47  ;;  %v381_v1 = vld [vmem:[%s1781_s18] sm:$0xff]  ;;  %v383_v3 = vld [vmem:[%s1781_s18 + $0x10] sm:$0xff]  ;;  %v541_v7 = vld [vmem:[%s2063_s2 + $0x18] sm:$0xff] }
  0x69   : > { %472 = vmatpush1.msra.mxu0 %v395_v32  ;;  %1198 = vmatprep.subr.mxu1 %v561_v49  ;;  %v385_v5 = vld [vmem:[%s1781_s18 + $0x20] sm:$0xff]  ;;  %v555_v10 = vld [vmem:[%s2063_s2 + $0x88] sm:$0xff]  ;;  %v675_v31 = vld [vmem:[%s2064_s3 + $0x78] sm:$0xff]  ;;  %s2029_s18 = scalar_lea.vmem (%p2077_p5), %s2070_s9, %s1180_s12  }
  0x6a   : > { %473 = vmatprep.subr.mxu0 %v394_v34  ;;  %1199 = vmatpush3.msra.mxu1 %v545_v51  ;;  %v556_v8 = vld [vmem:[%s2063_s2 + $0x90] sm:$0xff]  ;;  %v539_v11 = vld [vmem:[%s2063_s2 + $0x8] sm:$0xff]  ;;  %v554_v12 = vld [vmem:[%s2063_s2 + $0x80] sm:$0xff] }
  0x6b   : > { %474 = vmatpush1.msra.mxu0 %v393_v36  ;;  %1200 = vmatprep.subr.mxu1 %v560_v53  ;;  %v540_v9 = vld [vmem:[%s2063_s2 + $0x10] sm:$0xff]  ;;  %v538_v13 = vld [vmem:[%s2063_s2] sm:$0xff]  ;;  %v673_v39 = vld [vmem:[%s2064_s3 + $0x68] sm:$0xff] }
  0x6c   : > { %475 = vmatprep.subr.mxu0 %v392_v38  ;;  %1201 = vmatpush3.msra.mxu1 %v544_v55  ;;  %v427_v18 = vld [vmem:[%s2066_s5] sm:$0x3]  ;;  %v674_v34 = vld [vmem:[%s2064_s3 + $0x70] sm:$0xff]  ;;  %v767_v15 = vld [vmem:[%s2065_s4 + $0x8] sm:$0xff] }
  0x6d   : > { %476 = vmatpush1.msra.mxu0 %v391_v40  ;;  %1202 = vmatprep.subr.mxu1 %v559_v57  ;;  %v432_v20 = vrot.slane %v427_v18, %v431_v17  ;;  %v436_v21 = vrot.slane %v427_v18, %v435_v19  ;;  %v672_v41 = vld [vmem:[%s2064_s3 + $0x60] sm:$0xff]  ;;  %v670_v45 = vld [vmem:[%s2064_s3 + $0x50] sm:$0xff] }
  0x6e   : > { %477 = vmatprep.subr.mxu0 %v390_v42  ;;  %1203 = vmatpush3.msra.mxu1 %v543_v59  ;;  %v668_v47 = vld [vmem:[%s2064_s3 + $0x40] sm:$0xff]  ;;  %v666_v49 = vld [vmem:[%s2064_s3 + $0x30] sm:$0xff] }
  0x6f   : > { %478 = vmatpush1.msra.mxu0 %v389_v44  ;;  %1204 = vmatprep.subr.mxu1 %v558_v61  ;;  %v671_v44 = vld [vmem:[%s2064_s3 + $0x58] sm:$0xff]  ;;  %v664_v51 = vld [vmem:[%s2064_s3 + $0x20] sm:$0xff]  ;;  %v662_v53 = vld [vmem:[%s2064_s3 + $0x10] sm:$0xff] }
  0x70   : > { %479 = vmatprep.subr.mxu0 %v388_v46  ;;  %1205 = vmatpush3.msra.mxu1 %v542_v63  ;;  %v669_v46 = vld [vmem:[%s2064_s3 + $0x48] sm:$0xff]  ;;  %v660_v55 = vld [vmem:[%s2064_s3] sm:$0xff]  ;;  %v772_v57 = vld [vmem:[%s2065_s4 + $0x30] sm:$0xff] }
  0x71   : > { %480 = vmatpush1.msra.mxu0 %v387_v48  ;;  %1206 = vmatprep.subr.mxu1 %v557_v6  ;;  %v667_v48 = vld [vmem:[%s2064_s3 + $0x38] sm:$0xff]  ;;  %v770_v59 = vld [vmem:[%s2065_s4 + $0x20] sm:$0xff] }
  0x72   : > { %505 = vmatprep.subr.mxu0 %v426_v50  ;;  %1207 = vmatpush3.msra.mxu1 %v541_v7  ;;  %v665_v50 = vld [vmem:[%s2064_s3 + $0x28] sm:$0xff]  ;;  %v766_v16 = vld [vmem:[%s2065_s4] sm:$0xff] }
  0x73   : > { %506 = vmatpush2.msra.mxu0 %v425_v52  ;;  %1208 = vmatprep.subr.mxu1 %v556_v8  ;;  %v663_v52 = vld [vmem:[%s2064_s3 + $0x18] sm:$0xff]  ;;  %v1157_v17 = vld [vmem:[%s2068_s7] ss:$0 sm:$0xff] }
  0x74   : > { %507 = vmatprep.subr.mxu0 %v424_v54  ;;  %1209 = vmatpush3.msra.mxu1 %v540_v9  ;;  %v661_v54 = vld [vmem:[%s2064_s3 + $0x8] sm:$0xff] }
  0x75   : > { %508 = vmatpush2.msra.mxu0 %v423_v56  ;;  %1210 = vmatprep.subr.mxu1 %v555_v10  ;;  %v773_v56 = vld [vmem:[%s2065_s4 + $0x38] sm:$0xff] }
  0x76   : > { %509 = vmatprep.subr.mxu0 %v422_v58  ;;  %1211 = vmatpush3.msra.mxu1 %v539_v11  ;;  %v771_v58 = vld [vmem:[%s2065_s4 + $0x28] sm:$0xff] }
  0x77   : > { %510 = vmatpush2.msra.mxu0 %v421_v60  ;;  %1212 = vmatprep.subr.mxu1 %v554_v12  ;;  %v769_v60 = vld [vmem:[%s2065_s4 + $0x18] sm:$0xff] }
  0x78   : > { %511 = vmatprep.subr.mxu0 %v420_v62  ;;  %1213 = vmatpush3.msra.mxu1 %v538_v13  ;;  %v1156_v62 = vld [vmem:[%s2067_s6] ss:$0 sm:$0xff]  ;;  %v768_v13 = vld [vmem:[%s2065_s4 + $0x10] sm:$0xff] }
  0x79   : > { %512 = vmatpush2.msra.mxu0 %v419_v0  ;;  %1253 = vmatprep.subr.mxu1 %v1615_v14 }
  0x7a   : > { %514 = vmatmul.mubr.f32.vlgmr.msra.gmra.mxu0 %v381_v1  ;;  %1294 = vmatprep.subr.mxu0 %v1615_v14 }
  0x7b   : > { %1154 = vmatprep.mubr.msk.f32.mxu0 %vm439_vm0, %v384_v2  ;;  %1295 = vmatpush3.msra.mxu0 %v773_v56 }
  0x7c   : > { %1296 = vmatprep.subr.mxu0 %v1615_v14 }
  0x7d   : > { %1297 = vmatpush3.msra.mxu0 %v772_v57 }
  0x7e   : > { %520 = vmatmul.mubr.f32.gmra.mxu0 %v383_v3  ;;  %1298 = vmatprep.subr.mxu0 %v1615_v14 }
  0x7f   : > { %1155 = vmatprep.mubr.msk.f32.mxu0 %vm439_vm0, %v386_v4  ;;  %1299 = vmatpush3.msra.mxu0 %v771_v58 }
  0x80   : > { %1300 = vmatprep.subr.mxu0 %v1615_v14 }
  0x81   : > { %1301 = vmatpush3.msra.mxu0 %v770_v59 }
  0x82   : > { %526 = vmatmul.mubr.f32.gmra.mxu0 %v385_v5  ;;  %1302 = vmatprep.subr.mxu0 %v1615_v14 }
  0x83   : > { %1310 = vmatprep.mubr.msk.f32.mxu0 %vm1616_vm1, %v1615_v14  ;;  %1303 = vmatpush3.msra.mxu0 %v769_v60 }
  0x84   : > { %1304 = vmatprep.subr.mxu0 %v1615_v14 }
  0x85   : > { %1305 = vmatpush3.msra.mxu0 %v768_v13 }
  0x86   : > { %1306 = vmatprep.subr.mxu0 %v1615_v14 }
  0x87   : > { %1307 = vmatpush3.msra.mxu0 %v767_v15 }
  0x88   : > { %1308 = vmatprep.subr.mxu0 %v1615_v14 }
  0x89   : > { %1309 = vmatpush3.msra.mxu0 %v766_v16 }
 0x13a   : > { %v515_v22 = vpop.f32.mrf.mxu0 }
 0x13b   : > { %v516_v23 = vadd.f32 %v515_v22, %v432_v20 }
 0x13c   : > { %v517_v24 = vpop.f32.mrf.mxu0 }
 0x13d   : > { %v518_v25 = vadd.f32 %v517_v24, %v436_v21  ;;  %v532_v28 = vmax.f32 %v516_v23, 0.0 }
 0x13e   : > { %v521_v26 = vpop.f32.mrf.mxu0 }
 0x13f   : > { %v533_v27 = vmax.f32 %v518_v25, 0.0  ;;  %v522_v29 = vadd.f32 %v521_v26, %v432_v20 }
 0x140   : > { %v523_v30 = vpop.f32.mrf.mxu0 }
 0x141   : > { %v524_v32 = vadd.f32 %v523_v30, %v436_v21  ;;  %641 = vmatprep.mubr.f32.mxu1 %v533_v27  ;;  %v534_v36 = vmax.f32 %v522_v29, 0.0  ;;  %v1158_v30 = vld [vmem:[%s2069_s8] ss:$0 sm:$0xff] }
 0x142   : > { %v527_v33 = vpop.f32.mrf.mxu0  ;;  %642 = vmatmul.mubr.f32.vlgmr.msra.gmra.mxu1 %v532_v28 }
 0x143   : > { %v535_v35 = vmax.f32 %v524_v32, 0.0  ;;  %1254 = vmatpush3.msra.mxu1 %v675_v31  ;;  %v528_v37 = vadd.f32 %v527_v33, %v432_v20 }
 0x144   : > { %v529_v38 = vpop.f32.mrf.mxu0  ;;  %1255 = vmatprep.subr.mxu1 %v1615_v14 }
 0x145   : > { %v530_v40 = vadd.f32 %v529_v38, %v436_v21  ;;  %646 = vmatprep.mubr.f32.mxu1 %v535_v35  ;;  %1256 = vmatpush3.msra.mxu1 %v674_v34  ;;  %v536_v43 = vmax.f32 %v528_v37, 0.0 }
 0x146   : > { %647 = vmatmul.mubr.f32.gmra.mxu1 %v534_v36  ;;  %1257 = vmatprep.subr.mxu1 %v1615_v14 }
 0x147   : > { %v537_v42 = vmax.f32 %v530_v40, 0.0  ;;  %1258 = vmatpush3.msra.mxu1 %v673_v39 }
 0x148   : > { %1259 = vmatprep.subr.mxu1 %v1615_v14 }
 0x149   : > { %651 = vmatprep.mubr.f32.mxu1 %v537_v42  ;;  %1260 = vmatpush3.msra.mxu1 %v672_v41 }
 0x14a   : > { %652 = vmatmul.mubr.f32.gmra.mxu1 %v536_v43  ;;  %1261 = vmatprep.subr.mxu1 %v1615_v14 }
 0x14b   : > { %1262 = vmatpush3.msra.mxu1 %v671_v44  ;;  %1285 = vmatprep.mubr.msk.f32.mxu1 %vm1616_vm1, %v1615_v14 }
 0x14c   : > { %1263 = vmatprep.subr.mxu1 %v1615_v14 }
 0x14d   : > { %1264 = vmatpush3.msra.mxu1 %v670_v45 }
 0x14e   : > { %1265 = vmatprep.subr.mxu1 %v1615_v14 }
 0x14f   : > { %1266 = vmatpush3.msra.mxu1 %v669_v46 }
 0x150   : > { %1267 = vmatprep.subr.mxu1 %v1615_v14 }
 0x151   : > { %1268 = vmatpush3.msra.mxu1 %v668_v47 }
 0x152   : > { %1269 = vmatprep.subr.mxu1 %v1615_v14 }
 0x153   : > { %1270 = vmatpush3.msra.mxu1 %v667_v48 }
 0x154   : > { %1271 = vmatprep.subr.mxu1 %v1615_v14 }
 0x155   : > { %1272 = vmatpush3.msra.mxu1 %v666_v49 }
 0x156   : > { %1273 = vmatprep.subr.mxu1 %v1615_v14 }
 0x157   : > { %1274 = vmatpush3.msra.mxu1 %v665_v50 }
 0x158   : > { %1275 = vmatprep.subr.mxu1 %v1615_v14 }
 0x159   : > { %1276 = vmatpush3.msra.mxu1 %v664_v51 }
 0x15a   : > { %1277 = vmatprep.subr.mxu1 %v1615_v14 }
 0x15b   : > { %1278 = vmatpush3.msra.mxu1 %v663_v52 }
 0x15c   : > { %1279 = vmatprep.subr.mxu1 %v1615_v14 }
 0x15d   : > { %1280 = vmatpush3.msra.mxu1 %v662_v53 }
 0x15e   : > { %1281 = vmatprep.subr.mxu1 %v1615_v14 }
 0x15f   : > { %1282 = vmatpush3.msra.mxu1 %v661_v54 }
 0x160   : > { %1283 = vmatprep.subr.mxu1 %v1615_v14 }
 0x161   : > { %1284 = vmatpush3.msra.mxu1 %v660_v55 }
 0x202   : > { %v1214_v61 = vpop.f32.mrf.mxu1 }
 0x204   : > { %v1215_v63 = vpop.f32.mrf.mxu1 }
 0x205   : > { %v1216_v0 = vadd.f32 %v1215_v63, %v1214_v61 }
 0x206   : > { %v1217_v1 = vpop.f32.mrf.mxu1 }
 0x207   : > { %v644_v2 = vadd.f32 %v1216_v0, %v1156_v62 }
 0x208   : > { %v1218_v3 = vpop.f32.mrf.mxu1 }
 0x209   : > { %v657_v4 = vmax.f32 %v644_v2, 0.0  ;;  %v1219_v5 = vadd.f32 %v1218_v3, %v1217_v1 }
 0x20a   : > { %v1220_v6 = vpop.f32.mrf.mxu1 }
 0x20b   : > { %v649_v7 = vadd.f32 %v1219_v5, %v1156_v62  ;;  %1286 = vmatmul.mubr.f32.vlgmr.msra.gmra.mxu1 %v657_v4 }
 0x20c   : > { %v1221_v8 = vpop.f32.mrf.mxu1  ;;  %1288 = vmatprep.mubr.msk.f32.mxu1 %vm1616_vm1, %v1615_v14 }
 0x20d   : > { %v658_v9 = vmax.f32 %v649_v7, 0.0  ;;  %v1222_v10 = vadd.f32 %v1221_v8, %v1220_v6 }
 0x20f   : > { %v654_v11 = vadd.f32 %v1222_v10, %v1156_v62  ;;  %1289 = vmatmul.mubr.f32.gmra.mxu1 %v658_v9 }
 0x210   : > { %1291 = vmatprep.mubr.msk.f32.mxu1 %vm1616_vm1, %v1615_v14 }
 0x211   : > { %v659_v12 = vmax.f32 %v654_v11, 0.0 }
 0x213   : > { %1292 = vmatmul.mubr.f32.gmra.mxu1 %v659_v12 }
 0x2cb   : > { %v749_v18 = vpop.f32.mrf.mxu1 }
 0x2cc   : > { %v750_v19 = vadd.f32 %v1157_v17, %v749_v18 }
 0x2cd   : > { %v1287_v20 = vpop.f32.mrf.mxu1 }
 0x2ce   : > { %v763_v21 = vmax.f32 %v750_v19, 0.0 }
 0x2cf   : > { %v754_v22 = vpop.f32.mrf.mxu1 }
 0x2d0   : > { %v755_v23 = vadd.f32 %v1157_v17, %v754_v22  ;;  %1311 = vmatmul.mubr.msk.f32.vlgmr.msra.gmra.mxu0 %vm781_vm2, %v763_v21 }
 0x2d1   : > { %v1290_v24 = vpop.f32.mrf.mxu1  ;;  %1313 = vmatprep.mubr.msk.f32.mxu0 %vm1616_vm1, %v1615_v14 }
 0x2d2   : > { %v764_v25 = vmax.f32 %v755_v23, 0.0 }
 0x2d3   : > { %v759_v26 = vpop.f32.mrf.mxu1 }
 0x2d4   : > { %v760_v27 = vadd.f32 %v1157_v17, %v759_v26  ;;  %1314 = vmatmul.mubr.msk.f32.gmra.mxu0 %vm781_vm2, %v764_v25 }
 0x2d5   : > { %v1293_v28 = vpop.f32.mrf.mxu1  ;;  %1316 = vmatprep.mubr.msk.f32.mxu0 %vm1616_vm1, %v1615_v14 }
 0x2d6   : > { %v765_v29 = vmax.f32 %v760_v27, 0.0 }
 0x2d8   : > { %1317 = vmatmul.mubr.msk.f32.gmra.mxu0 %vm781_vm2, %v765_v29 }
 0x390   : > { %v857_v31 = vpop.f32.mrf.mxu0 }
 0x391   : > { %v858_v32 = vadd.f32 %v1158_v30, %v857_v31 }
 0x392   : > { %v1312_v33 = vpop.f32.mrf.mxu0 }
 0x393   : > { %v1162_v34 = vmul.f32 -1.442695, %v858_v32 }
 0x394   : > { %v862_v35 = vpop.f32.mrf.mxu0 }
 0x395   : > { %1437 = vpow2.f32 %v1162_v34  ;;  %v863_v36 = vadd.f32 %v1158_v30, %v862_v35 }
 0x396   : > { %v1315_v37 = vpop.f32.mrf.mxu0 }
 0x397   : > { %v1163_v38 = vmul.f32 -1.442695, %v863_v36 }
 0x398   : > { %v867_v39 = vpop.f32.mrf.mxu0 }
 0x399   : > { %1439 = vpow2.f32 %v1163_v38  ;;  %v868_v40 = vadd.f32 %v1158_v30, %v867_v39 }
 0x39a   : > { %v1318_v14 = vpop.f32.mrf.mxu0 }
 0x39b   : > { %v1164_v41 = vmul.f32 -1.442695, %v868_v40 }
 0x39d   : > { %1441 = vpow2.f32 %v1164_v41 }
 0x3a2   : > { %v1438_v42 = vpop.eup %1437 }
 0x3a3   : > { %v880_v43 = vadd.f32 1.0, %v1438_v42 }
 0x3a5   : > { %1443 = vrcp.f32 %v880_v43 }
 0x3a6   : > { %v1440_v44 = vpop.eup %1439 }
 0x3a7   : > { %v881_v45 = vadd.f32 1.0, %v1440_v44 }
 0x3a9   : > { %1445 = vrcp.f32 %v881_v45 }
 0x3aa   : > { %v1442_v46 = vpop.eup %1441 }
 0x3ab   : > { %v882_v47 = vadd.f32 1.0, %v1442_v46 }
 0x3ad   : > { %1447 = vrcp.f32 %v882_v47 }
 0x3b2   : > { %v1444_v48 = vpop.eup %1443 }
 0x3b3   : > { %890 = vst.msk [vmem:[%s2017_s23] sm:$0xff] %vm889_vm3, %v1444_v48 }
 0x3b6   : > { %v1446_v49 = vpop.eup %1445 }
 0x3b7   : > { %891 = vst.msk [vmem:[%s2017_s23 + $0x8] sm:$0xff] %vm889_vm3, %v1446_v49  ;;  %899 = sbr.rel (!%p2077_p5) target bundleno = 1009 (0x3f1), region = 68 }
 0x3ba   : > { %v1448_v50 = vpop.eup %1447 }
 0x3bb   : > { %892 = vst.msk [vmem:[%s2017_s23 + $0x10] sm:$0xff] %vm889_vm3, %v1448_v50 }
 0x3bc   : > { %s2085_s21 = smov (!%p902_p11, %s901_s21), 3 }
 0x3bd   : > { %s1165_s25 = sshll.u32 %s2085_s21, 7 }
 0x3be   : > { %p1168_p4 = scmp.eq.s32.totalorder %s1165_s25, 0 }
 0x3bf   : > { %1449 = sdivrem.u32 (!%p1168_p4), %s2085_s21, 3 }
 0x3c0   : > { %910 = sbr.rel (%p1168_p4) target bundleno = 1009 (0x3f1), region = 72 }
 0x3c8   : > { %s2035_s20 = spop.drf %1449 }
 0x3c9   : > { %p1169_p2 = scmp.le.s32.totalorder %s2035_s20, 0 }
 0x3ca   : > { %s1577_s13 = smov (!%p1169_p2), %s2029_s18   ;;  %s1581_s30 = smov (!%p1169_p2), %s2017_s23  }
 0x3cb   : > { %1084 = sbr.rel (%p1169_p2) target bundleno = 984 (0x3d8), region = 154  ;;  %s1585_s26 = smov (!%p1169_p2), 0  }
 0x3cc   : > { %s1589_s28 = smov (!%p1169_p2), 0  }
 0x3d0 LB: >> { %v979_v51 = vld [vmem:[%s1583_s30] sm:$0xff]  ;;  %v981_v52 = vld [vmem:[%s1583_s30 + $0x8] sm:$0xff]  ;;  %v983_v53 = vld [vmem:[%s1583_s30 + $0x10] sm:$0xff]  ;;  %s985_s15 = sadd.s32 1, %s1587_s26  ;;  %s973_s28 = sadd.s32 1, %s1591_s28   ;;  %s1591_s28 = sphi %s1589_s28, %s973_s28   ;;  %s1587_s26 = sphi %s1585_s26, %s1586_s26   ;;  %s1583_s30 = sphi %s1581_s30, %s990_s30   ;;  %s1579_s13 = sphi %s1577_s13, %s991_s13  }
 0x3d1   : >> { %980 = vst [vmem:[%s1579_s13] sm:$0xff] %v979_v51  ;;  %982 = vst [vmem:[%s1579_s13 + $0x8] sm:$0xff] %v981_v52  ;;  %p986_p3 = scmp.ge.s32.totalorder %s985_s15, %s2035_s20  ;;  %p972_p1 = scmp.ge.s32.totalorder %s973_s28, %s2035_s20 }
 0x3d2   : >> { %984 = vst [vmem:[%s1579_s13 + $0x10] sm:$0xff] %v983_v53 }
 0x3d3   : >> { %s2087_s15 = smov (%p986_p3, %s985_s15), 0  ;;  %975 = sbr.rel (!%p972_p1) target bundleno = 976 (0x3d0), region = 160 }
 0x3d4   : >> { %s988_s29 = smul.u32 24, %s2087_s15  ;;  %s1586_s26 = smov %s2087_s15  }
 0x3d6   : >> { %s990_s30 = scalar_lea.vmem %s2017_s23, %s988_s29 [#allocation6]   ;;  %s991_s13 = scalar_lea.vmem %s2029_s18, %s988_s29  }
 0x3d8 PF: > { %1451 = sdivrem.u32 %s2085_s21, 3 }
 0x3d9   : > { %s1170_s16 = smul.u32 24, %s2035_s20 }
 0x3db   : > { %s996_s24 = scalar_lea.vmem %s2017_s23, %s1170_s16 [#allocation6]   ;;  %s998_s19 = scalar_lea.vmem %s2029_s18, %s1170_s16  }
 0x3e1   : > { %s1452_s12 = spop.drf %1451 }
 0x3e2   : > { %p1172_p6 = scmp.le.s32.totalorder %s1452_s12, 0 }
 0x3e3   : > { %s1593_s22 = smov (!%p1172_p6), %s998_s19   ;;  %s1597_s27 = smov (!%p1172_p6), %s996_s24  }
 0x3e4   : > { %1098 = sbr.rel (%p1172_p6) target bundleno = 1009 (0x3f1), region = 165  ;;  %s1601_s25 = smov (!%p1172_p6), 0  }
 0x3e5   : > { %s1605_s13 = smov (!%p1172_p6), 0  }
 0x3e9 LB: >> { %v1008_v54 = vld [vmem:[%s1599_s27] sm:$0xff]  ;;  %s1010_s30 = sadd.s32 1, %s1603_s25  ;;  %s1002_s13 = sadd.s32 1, %s1607_s13   ;;  %s1607_s13 = sphi %s1605_s13, %s1002_s13   ;;  %s1603_s25 = sphi %s1601_s25, %s1602_s25   ;;  %s1599_s27 = sphi %s1597_s27, %s1015_s27   ;;  %s1595_s22 = sphi %s1593_s22, %s1016_s22  }
 0x3ea   : >> { %1009 = vst [vmem:[%s1595_s22] sm:$0xff] %v1008_v54  ;;  %p1011_p7 = scmp.ge.s32.totalorder %s1010_s30, %s1452_s12  ;;  %p1001_p9 = scmp.ge.s32.totalorder %s1002_s13, %s1452_s12 }
 0x3ec   : >> { %s2089_s30 = smov (%p1011_p7, %s1010_s30), 0  ;;  %1004 = sbr.rel (!%p1001_p9) target bundleno = 1001 (0x3e9), region = 171 }
 0x3ed   : >> { %s1173_s23 = sshll.u32 %s2089_s30, 3  ;;  %s1602_s25 = smov %s2089_s30  }
 0x3ee   : >> { %s1015_s27 = scalar_lea.vmem %s996_s24, %s1173_s23 [#allocation6]   ;;  %s1016_s22 = scalar_lea.vmem %s998_s19, %s1173_s23  }
 0x3f1 PF: > { %p20_p8 = scmp.ge.s32.totalorder %s1689_s14, 4   ;;  %s2078_s30 = smov %s1567_s10 }
 0x3f2   : > { %s2079_s10 = smov %s1571_s11  ;;  %s2080_s11 = smov %s1699_s17 }
 0x3f3   : > { %s2081_s12 = smov %s1689_s14  ;;  %22 = sbr.rel (!%p20_p8) target bundleno = 4 (0x4), region = 182 }
 0x3f8   :  { %1032 = vsyncpa [#allocation3], 1 }
 0x3f9   :  { %1034 = vsyncpa [#allocation3 + $0x1], 1 }
 0x3fa   :  { %1035 = vsyncpa [#allocation5], 1 }

</bundles_post_ra>
